<compile_context>
chip_gen: v5e
topology: v5e:2x2
jax: 0.10.0
libtpu: 0.0.40
codegen_flags: <defaults>
</compile_context>

<pallas_src>
import functools

import jax
import jax.numpy as jnp
import numpy as np
from jax.experimental import pallas as pl
from jax.experimental.pallas import tpu as pltpu


# ----------------------------------------------------------------------------
# Pallas kernel.
# ----------------------------------------------------------------------------
def _attention_cell_kernel(
    h_ref, c_ref, H_ref, mbias_ref, tail_ref,
    wi2h_ref, wh2h_ref, bh2h_ref, wscore_ref,
    wctx_ref, wtail_ref, bgate_ref,
    h_out_ref, c_out_ref, alpha_out_ref,
    *, B, T, D, Hd,
):
    f32 = jnp.float32
    bf16 = jnp.bfloat16

    h = h_ref[...]          # [B, Hd] f32
    c = c_ref[...]          # [B, Hd] f32
    Hmat = H_ref[...]       # [B, T, D] f32

    # batch_H_proj = i2h(batch_H) -> [B, T, Hd]
    # Flatten (B, T) -> rows for the MXU.  With T a multiple of 8 the lane dim
    # is unchanged and T == the sublane tile, so this reshape (and the one
    # below) is a pure relayout no-op — no VMEM copy is materialized.
    H_flat = Hmat.reshape(B * T, D)
    proj = jnp.dot(H_flat.astype(bf16), wi2h_ref[...],
                   preferred_element_type=f32)               # [B*T, Hd]
    proj = proj.reshape(B, T, Hd)

    # prev_hidden_proj = h2h(h).unsqueeze(1) -> [B, 1, Hd]
    hproj = jnp.dot(h.astype(bf16), wh2h_ref[...],
                    preferred_element_type=f32) + bh2h_ref[...]   # [B, Hd]

    # e = score(tanh(proj + hproj)) -> [B, T], plus the additive mask bias
    # (-1e30 where masked; replaces masked_fill_(-inf) without the NaN edge
    # case for fully-masked rows).
    th = jnp.tanh(proj + hproj[:, None, :])                       # [B, T, Hd] f32
    e = jnp.sum(th * wscore_ref[...][None, :, :], axis=-1)        # [B, T]
    e = e + mbias_ref[...]

    # softmax over T (masked entries underflow to exactly 0)
    e_max = jnp.max(e, axis=1, keepdims=True)
    p = jnp.exp(e - e_max)
    denom = jnp.sum(p, axis=1, keepdims=True)
    alpha = p * pl.reciprocal(denom, approx=True)                 # [B, T]
    alpha_out_ref[...] = alpha

    # context = bmm(alpha^T, batch_H).squeeze(1) -> [B, D]   (f32 elementwise)
    context = jnp.sum(alpha[:, :, None] * Hmat, axis=1)

    # LSTMCell gates.  Fused: [context] @ W_ctx + [onehot | h] @ W_tail + bias
    # (the one-hot and hidden halves of W_ih/W_hh were stacked at prep time,
    # so the wasteful K=E matmul is gone).
    gates = (
        jnp.dot(context.astype(bf16), wctx_ref[...], preferred_element_type=f32)
        + jnp.dot(tail_ref[...].astype(bf16), wtail_ref[...],
                  preferred_element_type=f32)
        + bgate_ref[...]
    )                                                             # [B, 4*Hd] f32

    i_g = jax.nn.sigmoid(gates[:, 0 * Hd:1 * Hd])
    f_g = jax.nn.sigmoid(gates[:, 1 * Hd:2 * Hd])
    g_g = jnp.tanh(gates[:, 2 * Hd:3 * Hd])
    o_g = jax.nn.sigmoid(gates[:, 3 * Hd:4 * Hd])

    c_new = f_g * c + i_g * g_g
    h_new = o_g * jnp.tanh(c_new)

    h_out_ref[...] = h_new
    c_out_ref[...] = c_new


# ----------------------------------------------------------------------------
# One-time parameter prep (hoisted out of the per-step call).
# ----------------------------------------------------------------------------
def prep_attention_cell_params(params):
    Hd = params["w_h2h"].shape[0]
    D = params["w_i2h"].shape[1]
    E = int(params["num_embeddings"])

    wih = params["w_ih"]                                   # [4Hd, D+E]
    wctx_T = wih[:, :D].T                                  # [D, 4Hd]
    whh_T = params["w_hh"].T                               # [Hd, 4Hd]
    if E > 0:
        wemb_T = wih[:, D:].T                              # [E, 4Hd]
        wtail = jnp.concatenate([wemb_T, whh_T], axis=0)   # [E+Hd, 4Hd]
    else:
        wtail = whh_T                                      # [Hd, 4Hd]

    return dict(
        D=D, Hd=Hd, E=E,
        # MXU operands in bf16 (f32 accumulation happens in-kernel).
        wi2h=params["w_i2h"].T.astype(jnp.bfloat16),       # [D, Hd]
        wh2h=params["w_h2h"].T.astype(jnp.bfloat16),       # [Hd, Hd]
        wctx=wctx_T.astype(jnp.bfloat16),                  # [D, 4Hd]
        wtail=wtail.astype(jnp.bfloat16),                  # [E+Hd, 4Hd]
        # Scalars / biases stay f32.
        b_h2h=params["b_h2h"].reshape(1, Hd).astype(jnp.float32),
        wscore=params["w_score"].astype(jnp.float32),      # [1, Hd]
        b_gate=(params["b_ih"] + params["b_hh"]).reshape(1, 4 * Hd)
        .astype(jnp.float32),
    )


# ----------------------------------------------------------------------------
# Per-step wrapper (only per-step plumbing: mask bias, [onehot|h] concat).
# ----------------------------------------------------------------------------
def attention_cell_forward(prepped, prev_hidden, batch_H, mask, char_onehots=None):
    h, c = prev_hidden
    B, T, D = batch_H.shape
    Hd, E = prepped["Hd"], prepped["E"]

    h = h.astype(jnp.float32)
    c = c.astype(jnp.float32)

    # Additive mask bias (True == masked out, mirrors torch masked_fill_).
    mask_bias = jnp.where(mask, jnp.float32(-1e30), jnp.float32(0.0))

    # Tail of the LSTM input: [char_onehots | h]  (just h if no embeddings).
    if E > 0:
        tail = jnp.concatenate([char_onehots.astype(jnp.float32), h], axis=1)
    else:
        tail = h

    kernel = functools.partial(_attention_cell_kernel, B=B, T=T, D=D, Hd=Hd)
    vmem = pl.BlockSpec(memory_space=pltpu.MemorySpace.VMEM)

    h_new, c_new, alpha = pl.pallas_call(
        kernel,
        out_shape=(
            jax.ShapeDtypeStruct((B, Hd), jnp.float32),
            jax.ShapeDtypeStruct((B, Hd), jnp.float32),
            jax.ShapeDtypeStruct((B, T), jnp.float32),
        ),
        in_specs=[vmem] * 12,
        out_specs=(vmem, vmem, vmem),
    )(
        h, c, batch_H.astype(jnp.float32), mask_bias, tail,
        prepped["wi2h"], prepped["wh2h"], prepped["b_h2h"], prepped["wscore"],
        prepped["wctx"], prepped["wtail"], prepped["b_gate"],
    )
    return (h_new, c_new), alpha.reshape(B, T, 1)


# ----------------------------------------------------------------------------
# Plain-JAX reference (mirrors the PyTorch forward, f32 throughout).
# ----------------------------------------------------------------------------
def reference_forward(params, prev_hidden, batch_H, mask, char_onehots=None):
    hp = jax.lax.Precision.HIGHEST
    h, c = prev_hidden
    Hd = params["w_h2h"].shape[0]

    proj = jnp.einsum("btd,hd->bth", batch_H, params["w_i2h"], precision=hp)
    hproj = jnp.einsum("bk,hk->bh", h, params["w_h2h"], precision=hp) + params["b_h2h"]
    e = jnp.einsum("bth,oh->bto", jnp.tanh(proj + hproj[:, None, :]),
                   params["w_score"], precision=hp)              # [B, T, 1]
    e = jnp.where(mask[:, :, None], -jnp.inf, e)
    alpha = jax.nn.softmax(e, axis=1)                            # [B, T, 1]
    context = jnp.einsum("bto,btd->bod", alpha, batch_H, precision=hp)[:, 0, :]
    if params["num_embeddings"] > 0:
        context = jnp.concatenate([context, char_onehots], axis=1)
    gates = (jnp.matmul(context, params["w_ih"].T, precision=hp) + params["b_ih"]
             + jnp.matmul(h, params["w_hh"].T, precision=hp) + params["b_hh"])
    i = jax.nn.sigmoid(gates[:, :Hd])
    f = jax.nn.sigmoid(gates[:, Hd:2 * Hd])
    g = jnp.tanh(gates[:, 2 * Hd:3 * Hd])
    o = jax.nn.sigmoid(gates[:, 3 * Hd:4 * Hd])
    c_new = f * c + i * g
    h_new = o * jnp.tanh(c_new)
    return (h_new, c_new), alpha


def init_params(key, input_size, hidden_size, num_embeddings):
    ks = jax.random.split(key, 8)
    s = 0.1

    def w(k, shape):
        return jax.random.normal(k, shape, jnp.float32) * s

    return dict(
        w_i2h=w(ks[0], (hidden_size, input_size)),                       # i2h (no bias)
        w_h2h=w(ks[1], (hidden_size, hidden_size)),                      # h2h
        b_h2h=w(ks[2], (hidden_size,)),
        w_score=w(ks[3], (1, hidden_size)),                              # score (no bias)
        w_ih=w(ks[4], (4 * hidden_size, input_size + num_embeddings)),   # LSTMCell
        w_hh=w(ks[5], (4 * hidden_size, hidden_size)),
        b_ih=w(ks[6], (4 * hidden_size,)),
        b_hh=w(ks[7], (4 * hidden_size,)),
        num_embeddings=num_embeddings,
    )


if __name__ == "__main__":
    B, T, D, Hd, E = 2, 8, 32, 32, 6

    key = jax.random.PRNGKey(0)
    kp, kh, kc, kx, kid = jax.random.split(key, 5)

    params = init_params(kp, input_size=D, hidden_size=Hd, num_embeddings=E)
    prepped = prep_attention_cell_params(params)   # one-time weight prep

    batch_H = jax.random.normal(kx, (B, T, D), jnp.float32)
    h0 = jax.random.normal(kh, (B, Hd), jnp.float32)
    c0 = jax.random.normal(kc, (B, Hd), jnp.float32)

    # per-sequence lengths -> boolean pad mask (True == masked out)
    lengths = jnp.array([T, 5], dtype=jnp.int32)
    mask = jnp.arange(T)[None, :] >= lengths[:, None]                 # [B, T] bool

    char_ids = jax.random.randint(kid, (B,), 0, E)
    char_onehots = jax.nn.one_hot(char_ids, E, dtype=jnp.float32)     # [B, E]

    (h_new, c_new), alpha = attention_cell_forward(
        prepped, (h0, c0), batch_H, mask, char_onehots)
    jax.block_until_ready((h_new, c_new, alpha))

    (h_ref, c_ref), alpha_ref = reference_forward(
        params, (h0, c0), batch_H, mask, char_onehots)

    assert h_new.shape == (B, Hd) and c_new.shape == (B, Hd)
    assert alpha.shape == (B, T, 1)
    # bf16 MXU operands vs f32 reference -> slightly looser tolerances.
    assert np.allclose(np.asarray(alpha), np.asarray(alpha_ref), rtol=2e-2, atol=2e-2)
    assert np.allclose(np.asarray(h_new), np.asarray(h_ref), rtol=2e-2, atol=2e-2)
    assert np.allclose(np.asarray(c_new), np.asarray(c_ref), rtol=2e-2, atol=2e-2)

    print("KERNEL_OK")
</pallas_src>

<mosaic_0001>
module attributes {stable_mosaic.version = 11 : i64} {
  func.func @_attention_cell_kernel(%arg0: memref<2x32xf32, #tpu.memory_space<vmem>>, %arg1: memref<2x32xf32, #tpu.memory_space<vmem>>, %arg2: memref<2x8x32xf32, #tpu.memory_space<vmem>>, %arg3: memref<2x8xf32, #tpu.memory_space<vmem>>, %arg4: memref<2x38xf32, #tpu.memory_space<vmem>>, %arg5: memref<32x32xbf16, #tpu.memory_space<vmem>>, %arg6: memref<32x32xbf16, #tpu.memory_space<vmem>>, %arg7: memref<1x32xf32, #tpu.memory_space<vmem>>, %arg8: memref<1x32xf32, #tpu.memory_space<vmem>>, %arg9: memref<32x128xbf16, #tpu.memory_space<vmem>>, %arg10: memref<38x128xbf16, #tpu.memory_space<vmem>>, %arg11: memref<1x128xf32, #tpu.memory_space<vmem>>, %arg12: memref<2x32xf32, #tpu.memory_space<vmem>>, %arg13: memref<2x32xf32, #tpu.memory_space<vmem>>, %arg14: memref<2x8xf32, #tpu.memory_space<vmem>>) attributes {dimension_semantics = [], scalar_prefetch = 0 : i64, scratch_operands = 0 : i64, tpu.core_type = #tpu.core_type<tc>} {
    %c0 = arith.constant 0 : index
    %c0_0 = arith.constant 0 : index
    %0 = vector.load %arg0[%c0, %c0_0] : memref<2x32xf32, #tpu.memory_space<vmem>>, vector<2x32xf32>
    %c0_1 = arith.constant 0 : index
    %c0_2 = arith.constant 0 : index
    %1 = vector.load %arg1[%c0_1, %c0_2] : memref<2x32xf32, #tpu.memory_space<vmem>>, vector<2x32xf32>
    %c0_3 = arith.constant 0 : index
    %c0_4 = arith.constant 0 : index
    %c0_5 = arith.constant 0 : index
    %2 = vector.load %arg2[%c0_3, %c0_4, %c0_5] : memref<2x8x32xf32, #tpu.memory_space<vmem>>, vector<2x8x32xf32>
    %3 = vector.shape_cast %2 : vector<2x8x32xf32> to vector<16x32xf32>
    %4 = arith.truncf %3 : vector<16x32xf32> to vector<16x32xbf16>
    %c0_6 = arith.constant 0 : index
    %c0_7 = arith.constant 0 : index
    %5 = vector.load %arg5[%c0_6, %c0_7] : memref<32x32xbf16, #tpu.memory_space<vmem>>, vector<32x32xbf16>
    %cst = arith.constant dense<0.000000e+00> : vector<16x32xf32>
    %6 = tpu.matmul %4, %5, %cst {dimension_numbers = #tpu.dot_dimension_numbers<[1], [0], [0], [1], [0, 0, 1, 1], [], []>} : vector<16x32xbf16>, vector<32x32xbf16>, vector<16x32xf32> -> vector<16x32xf32>
    %7 = vector.shape_cast %6 : vector<16x32xf32> to vector<2x8x32xf32>
    %8 = arith.truncf %0 : vector<2x32xf32> to vector<2x32xbf16>
    %c0_8 = arith.constant 0 : index
    %c0_9 = arith.constant 0 : index
    %9 = vector.load %arg6[%c0_8, %c0_9] : memref<32x32xbf16, #tpu.memory_space<vmem>>, vector<32x32xbf16>
    %cst_10 = arith.constant dense<0.000000e+00> : vector<2x32xf32>
    %10 = tpu.matmul %8, %9, %cst_10 {dimension_numbers = #tpu.dot_dimension_numbers<[1], [0], [0], [1], [0, 0, 1, 1], [], []>} : vector<2x32xbf16>, vector<32x32xbf16>, vector<2x32xf32> -> vector<2x32xf32>
    %c0_11 = arith.constant 0 : index
    %c0_12 = arith.constant 0 : index
    %11 = vector.load %arg7[%c0_11, %c0_12] : memref<1x32xf32, #tpu.memory_space<vmem>>, vector<1x32xf32>
    %12 = vector.broadcast %11 : vector<1x32xf32> to vector<2x32xf32>
    %13 = arith.addf %10, %12 : vector<2x32xf32>
    %14 = vector.shape_cast %13 : vector<2x32xf32> to vector<2x1x32xf32>
    %15 = vector.broadcast %14 : vector<2x1x32xf32> to vector<2x8x32xf32>
    %16 = arith.addf %7, %15 : vector<2x8x32xf32>
    %17 = math.tanh %16 : vector<2x8x32xf32>
    %c0_13 = arith.constant 0 : index
    %c0_14 = arith.constant 0 : index
    %18 = vector.load %arg8[%c0_13, %c0_14] : memref<1x32xf32, #tpu.memory_space<vmem>>, vector<1x32xf32>
    %19 = vector.shape_cast %18 : vector<1x32xf32> to vector<1x1x32xf32>
    %20 = vector.broadcast %19 : vector<1x1x32xf32> to vector<2x8x32xf32>
    %21 = arith.mulf %17, %20 : vector<2x8x32xf32>
    %cst_15 = arith.constant dense<0.000000e+00> : vector<2x8xf32>
    %22 = vector.multi_reduction <add>, %21, %cst_15 [2] : vector<2x8x32xf32> to vector<2x8xf32>
    %c0_16 = arith.constant 0 : index
    %c0_17 = arith.constant 0 : index
    %23 = vector.load %arg3[%c0_16, %c0_17] : memref<2x8xf32, #tpu.memory_space<vmem>>, vector<2x8xf32>
    %24 = arith.addf %22, %23 : vector<2x8xf32>
    %cst_18 = arith.constant dense<0xFF800000> : vector<2xf32>
    %25 = vector.multi_reduction <maximumf>, %24, %cst_18 [1] : vector<2x8xf32> to vector<2xf32>
    %26 = vector.shape_cast %25 : vector<2xf32> to vector<2x1xf32>
    %27 = vector.broadcast %26 : vector<2x1xf32> to vector<2x8xf32>
    %28 = arith.subf %24, %27 : vector<2x8xf32>
    %29 = math.exp %28 : vector<2x8xf32>
    %cst_19 = arith.constant dense<0.000000e+00> : vector<2xf32>
    %30 = vector.multi_reduction <add>, %29, %cst_19 [1] : vector<2x8xf32> to vector<2xf32>
    %31 = vector.shape_cast %30 : vector<2xf32> to vector<2x1xf32>
    %32 = tpu.reciprocal %31 {approx = true} : vector<2x1xf32> -> vector<2x1xf32>
    %33 = vector.broadcast %32 : vector<2x1xf32> to vector<2x8xf32>
    %34 = arith.mulf %29, %33 : vector<2x8xf32>
    %c0_20 = arith.constant 0 : index
    %c0_21 = arith.constant 0 : index
    %35 = vector.load %arg14[%c0_20, %c0_21] : memref<2x8xf32, #tpu.memory_space<vmem>>, vector<2x8xf32>
    tpu.vector_store %arg14[%c0_20, %c0_21], %34 {strides = array<i32>} : memref<2x8xf32, #tpu.memory_space<vmem>>, vector<2x8xf32>,
    %36 = vector.shape_cast %34 : vector<2x8xf32> to vector<2x8x1xf32>
    %37 = vector.broadcast %36 : vector<2x8x1xf32> to vector<2x8x32xf32>
    %38 = arith.mulf %37, %2 : vector<2x8x32xf32>
    %cst_22 = arith.constant dense<0.000000e+00> : vector<2x32xf32>
    %39 = vector.multi_reduction <add>, %38, %cst_22 [1] : vector<2x8x32xf32> to vector<2x32xf32>
    %40 = arith.truncf %39 : vector<2x32xf32> to vector<2x32xbf16>
    %c0_23 = arith.constant 0 : index
    %c0_24 = arith.constant 0 : index
    %41 = vector.load %arg9[%c0_23, %c0_24] : memref<32x128xbf16, #tpu.memory_space<vmem>>, vector<32x128xbf16>
    %cst_25 = arith.constant dense<0.000000e+00> : vector<2x128xf32>
    %42 = tpu.matmul %40, %41, %cst_25 {dimension_numbers = #tpu.dot_dimension_numbers<[1], [0], [0], [1], [0, 0, 1, 1], [], []>} : vector<2x32xbf16>, vector<32x128xbf16>, vector<2x128xf32> -> vector<2x128xf32>
    %c0_26 = arith.constant 0 : index
    %c0_27 = arith.constant 0 : index
    %43 = vector.load %arg4[%c0_26, %c0_27] : memref<2x38xf32, #tpu.memory_space<vmem>>, vector<2x38xf32>
    %44 = arith.truncf %43 : vector<2x38xf32> to vector<2x38xbf16>
    %c0_28 = arith.constant 0 : index
    %c0_29 = arith.constant 0 : index
    %45 = vector.load %arg10[%c0_28, %c0_29] : memref<38x128xbf16, #tpu.memory_space<vmem>>, vector<38x128xbf16>
    %cst_30 = arith.constant dense<0.000000e+00> : vector<2x128xf32>
    %46 = tpu.matmul %44, %45, %cst_30 {dimension_numbers = #tpu.dot_dimension_numbers<[1], [0], [0], [1], [0, 0, 1, 1], [], []>} : vector<2x38xbf16>, vector<38x128xbf16>, vector<2x128xf32> -> vector<2x128xf32>
    %47 = arith.addf %42, %46 : vector<2x128xf32>
    %c0_31 = arith.constant 0 : index
    %c0_32 = arith.constant 0 : index
    %48 = vector.load %arg11[%c0_31, %c0_32] : memref<1x128xf32, #tpu.memory_space<vmem>>, vector<1x128xf32>
    %49 = vector.broadcast %48 : vector<1x128xf32> to vector<2x128xf32>
    %50 = arith.addf %47, %49 : vector<2x128xf32>
    %51 = vector.extract_strided_slice %50 {offsets = [0, 0], sizes = [2, 32], strides = [1, 1]} : vector<2x128xf32> to vector<2x32xf32>
    %52 = arith.negf %51 : vector<2x32xf32>
    %53 = math.exp %52 : vector<2x32xf32>
    %cst_33 = arith.constant 1.000000e+00 : f32
    %54 = vector.broadcast %cst_33 : f32 to vector<2x32xf32>
    %55 = arith.addf %54, %53 : vector<2x32xf32>
    %56 = arith.divf %54, %55 : vector<2x32xf32>
    %57 = vector.extract_strided_slice %50 {offsets = [0, 32], sizes = [2, 32], strides = [1, 1]} : vector<2x128xf32> to vector<2x32xf32>
    %58 = arith.negf %57 : vector<2x32xf32>
    %59 = math.exp %58 : vector<2x32xf32>
    %cst_34 = arith.constant 1.000000e+00 : f32
    %60 = vector.broadcast %cst_34 : f32 to vector<2x32xf32>
    %61 = arith.addf %60, %59 : vector<2x32xf32>
    %62 = arith.divf %60, %61 : vector<2x32xf32>
    %63 = vector.extract_strided_slice %50 {offsets = [0, 64], sizes = [2, 32], strides = [1, 1]} : vector<2x128xf32> to vector<2x32xf32>
    %64 = math.tanh %63 : vector<2x32xf32>
    %65 = vector.extract_strided_slice %50 {offsets = [0, 96], sizes = [2, 32], strides = [1, 1]} : vector<2x128xf32> to vector<2x32xf32>
    %66 = arith.negf %65 : vector<2x32xf32>
    %67 = math.exp %66 : vector<2x32xf32>
    %cst_35 = arith.constant 1.000000e+00 : f32
    %68 = vector.broadcast %cst_35 : f32 to vector<2x32xf32>
    %69 = arith.addf %68, %67 : vector<2x32xf32>
    %70 = arith.divf %68, %69 : vector<2x32xf32>
    %71 = arith.mulf %62, %1 : vector<2x32xf32>
    %72 = arith.mulf %56, %64 : vector<2x32xf32>
    %73 = arith.addf %71, %72 : vector<2x32xf32>
    %74 = math.tanh %73 : vector<2x32xf32>
    %75 = arith.mulf %70, %74 : vector<2x32xf32>
    %c0_36 = arith.constant 0 : index
    %c0_37 = arith.constant 0 : index
    %76 = vector.load %arg12[%c0_36, %c0_37] : memref<2x32xf32, #tpu.memory_space<vmem>>, vector<2x32xf32>
    tpu.vector_store %arg12[%c0_36, %c0_37], %75 {strides = array<i32>} : memref<2x32xf32, #tpu.memory_space<vmem>>, vector<2x32xf32>,
    %c0_38 = arith.constant 0 : index
    %c0_39 = arith.constant 0 : index
    %77 = vector.load %arg13[%c0_38, %c0_39] : memref<2x32xf32, #tpu.memory_space<vmem>>, vector<2x32xf32>
    tpu.vector_store %arg13[%c0_38, %c0_39], %73 {strides = array<i32>} : memref<2x32xf32, #tpu.memory_space<vmem>>, vector<2x32xf32>,
    return
  }
}

</mosaic_0001>

<bundles_post_ra>
// kernel: tpu_custom_call.1
= control target key start
LH: loop header
LB: loop body
LE: loop exit
PB: predicated region body
PF: predicated region fallthrough
CT: control target
= control target key end

     0   :  { %20 = vsyncpa [#allocation3], 0  ;;  %s1113_s0 = inlined_call_operand.hbm [shape: f32[2,32], index: 0, kind: input, shape index: {}]   ;;  %s1114_s1 = inlined_call_operand.hbm [shape: f32[2,32], index: 1, kind: input, shape index: {}]   ;;  %s1115_s2 = inlined_call_operand.hbm [shape: f32[2,8,32], index: 2, kind: input, shape index: {}]   ;;  %s1116_s3 = inlined_call_operand.vmem [shape: f32[2,8], index: 3, kind: input, shape index: {}]   ;;  %s1117_s4 = inlined_call_operand.hbm [shape: f32[2,38], index: 4, kind: input, shape index: {}]   ;;  %s1118_s5 = inlined_call_operand.hbm [shape: bf16[32,32], index: 5, kind: input, shape index: {}]   ;;  %s1119_s6 = inlined_call_operand.hbm [shape: bf16[32,32], index: 6, kind: input, shape index: {}]   ;;  %s1120_s7 = inlined_call_operand.vmem [shape: f32[1,32], index: 7, kind: input, shape index: {}]   ;;  %s1121_s8 = inlined_call_operand.vmem [shape: f32[1,32], index: 8, kind: input, shape index: {}]   ;;  %s1122_s9 = inlined_call_operand.hbm [shape: bf16[32,128], index: 9, kind: input, shape index: {}]   ;;  %s1123_s10 = inlined_call_operand.hbm [shape: bf16[38,128], index: 10, kind: input, shape index: {}]   ;;  %s1124_s11 = inlined_call_operand.vmem [shape: f32[1,128], index: 11, kind: input, shape index: {}]   ;;  %s1125_s12 = inlined_call_operand.hbm [shape: f32[2,32], index: 12, kind: output, shape index: {0}]   ;;  %s1126_s13 = inlined_call_operand.hbm [shape: f32[2,32], index: 13, kind: output, shape index: {1}]   ;;  %s1127_s14 = inlined_call_operand.hbm [shape: f32[2,8], index: 14, kind: output, shape index: {2}]  }
   0x1   :  { %21 = vsyncpa [#allocation6], 0 }
   0x2   :  { %22 = vsyncpa [#allocation9], 0 }
   0x3   :  { %23 = vsyncpa [#allocation12], 0 }
   0x4   :  { %24 = vsyncpa [#allocation15], 0 }
   0x5   :  { %25 = vsyncpa [#allocation4], 0  ;;  %s43_s15 = sshll.u32 %s1114_s1, 4  ;;  %s44_s15 = int_to_ptr.hbm [resolvable:$true] %s43_s15 }
   0x6   :  { %26 = vsyncpa [#allocation18], 0  ;;  %s926_s16 = smov [#allocation5]   ;;  %s69_s20 = sshll.u32 %s1117_s4, 4  ;;  %s70_s20 = int_to_ptr.hbm [resolvable:$true] %s69_s20 }
   0x7   :  { %s45_s17 = sshll.u32 %s926_s16, 4  ;;  %s927_s21 = smov [#allocation8]   ;;  %s46_s17 = int_to_ptr.vmem [resolvable:$true] %s45_s17 }
   0x8   :  { %48 = dma.hbm_to_vmem [thread:$0]  %s44_s15, 32, %s46_s17, [#allocation6]  }
   0x9   :  { %s71_s22 = sshll.u32 %s927_s21, 4  ;;  %s92_s25 = sshll.u32 %s1119_s6, 4  ;;  %s72_s22 = int_to_ptr.vmem [resolvable:$true] %s71_s22  ;;  %s93_s25 = int_to_ptr.hbm [resolvable:$true] %s92_s25 }
   0xa   :  { %74 = dma.hbm_to_vmem [thread:$0]  %s70_s20, 32, %s72_s22, [#allocation9]  }
   0xb   :  { %s928_s1 = smov [#allocation11]   ;;  %s32_s29 = sshll.u32 %s1113_s0, 4  ;;  %s33_s29 = int_to_ptr.hbm [resolvable:$true] %s32_s29 }
   0xc   :  { %s94_s26 = sshll.u32 %s928_s1, 4  ;;  %s929_s30 = smov 64   ;;  %s95_s26 = int_to_ptr.vmem [resolvable:$true] %s94_s26 }
   0xd   :  { %s930_s4 = smov 4   ;;  %s931_s15 = smov [#allocation2]  }
   0xe   :  { %100 = dma.hbm_to_vmem [thread:$0]  %s93_s25, 256, %s95_s26, [#allocation12], %s929_s30, %s929_s30, %s930_s4  }
   0xf   :  { %s34_s16 = sshll.u32 %s931_s15, 4  ;;  %s53_s6 = sshll.u32 %s1115_s2, 4  ;;  %s35_s16 = int_to_ptr.vmem [resolvable:$true] %s34_s16  ;;  %s54_s6 = int_to_ptr.hbm [resolvable:$true] %s53_s6 }
  0x10   :  { %37 = dma.hbm_to_vmem [thread:$0]  %s33_s29, 32, %s35_s16, [#allocation3]  }
  0x11   :  { %s932_s19 = smov [#allocation7]   ;;  %s79_s22 = sshll.u32 %s1118_s5, 4  ;;  %s80_s22 = int_to_ptr.hbm [resolvable:$true] %s79_s22 }
  0x12   :  { %s55_s20 = sshll.u32 %s932_s19, 4  ;;  %s933_s23 = smov 128   ;;  %s56_s20 = int_to_ptr.vmem [resolvable:$true] %s55_s20 }
  0x13   :  { %s934_s24 = smov 8   ;;  %s935_s25 = smov [#allocation10]  }
  0x14   :  { %61 = dma.hbm_to_vmem [thread:$0]  %s54_s6, 256, %s56_s20, [#allocation6], %s933_s23, %s933_s23, %s934_s24  }
  0x15   :  { %s81_s1 = sshll.u32 %s935_s25, 4  ;;  %s109_s2 = sshll.u32 %s1122_s9, 4  ;;  %s82_s1 = int_to_ptr.vmem [resolvable:$true] %s81_s1  ;;  %s110_s2 = int_to_ptr.hbm [resolvable:$true] %s109_s2 }
  0x16   :  { %87 = dma.hbm_to_vmem [thread:$0]  %s80_s22, 256, %s82_s1, [#allocation9], %s929_s30, %s929_s30, %s930_s4  }
  0x17   :  { %s122_s5 = sshll.u32 %s1123_s10, 4  ;;  %s936_s15 = smov [#allocation13]   ;;  %s123_s5 = int_to_ptr.hbm [resolvable:$true] %s122_s5 }
  0x18   :  { %s111_s16 = sshll.u32 %s936_s15, 4  ;;  %s937_s17 = smov [#allocation14]   ;;  %s112_s16 = int_to_ptr.vmem [resolvable:$true] %s111_s16 }
  0x19   :  { %117 = dma.hbm_to_vmem [thread:$0]  %s110_s2, 256, %s112_s16, [#allocation12], %s929_s30, %s929_s30, %s930_s4  }
  0x1a   :  { %s124_s9 = sshll.u32 %s937_s17, 4  ;;  %s125_s9 = int_to_ptr.vmem [resolvable:$true] %s124_s9 }
  0x1b   :  { %130 = dma.hbm_to_vmem [thread:$0]  %s123_s5, 320, %s125_s9, [#allocation15], %s929_s30, %s929_s30, %s930_s4  }
  0x1c   :  { %912 = dma.done.wait [#allocation3], 32  }
  0x1d   :  { %913 = vsyncadd [#allocation3], 4294967264 }
  0x1e   :  { %914 = dma.done.wait [#allocation6], 288  }
  0x1f   :  { %915 = vsyncadd [#allocation6], 4294967008 }
  0x20   :  { %916 = dma.done.wait [#allocation9], 288  }
  0x21   :  { %917 = vsyncadd [#allocation9], 4294967008 }
  0x22   :  { %918 = dma.done.wait [#allocation12], 512  }
  0x23   :  { %919 = vsyncadd [#allocation12], 4294966784 }
  0x24   :  { %920 = dma.done.wait [#allocation15], 320  }
  0x25   :  { %921 = vsyncadd [#allocation15], 4294966976  ;;  %v598_v0 = vld [vmem:[#allocation10 + $0x8] sm:$0xff]  ;;  %v600_v1 = vld [vmem:[#allocation11 + $0x8] sm:$0xff]  ;;  %vm187_vm0 = vcmask 261120   ;;  %v267_v9 = vlaneseq  ;;  %v938_v32 = vmov 0  }
  0x26   :  { %v597_v2 = vld [vmem:[#allocation10] sm:$0xff]  ;;  %v599_v3 = vld [vmem:[#allocation11] sm:$0xff]  ;;  %197 = vmatpush.bf16.msra.mxu0 %v598_v0  ;;  %235 = vmatpush.bf16.msra.mxu1 %v600_v1  ;;  %v166_v6 = vld [vmem:[#allocation2] sm:$0x3]  ;;  %vm296_vm1 = vcmask 1041409   ;;  %vm299_vm2 = vcmask 58368  }
  0x27   :  { %v1055_v4 = vld [vmem:[#allocation7] sm:$0xff]  ;;  %v1057_v5 = vld [vmem:[#allocation7 + $0x8] sm:$0xff]  ;;  %v205_v8 = vpack.c.bf16 %v166_v6, %v166_v6  ;;  %v268_v10 = vshrl.u32 %v267_v9, 7  ;;  %v264_v11 = vld [vmem:[%s1116_s3] sm:$0x3]  ;;  %624 = vset.pattern.permute.xlu2 %v938_v32  ;;  %626 = vset.pattern.permute.xlu0 %v938_v32  ;;  %v1074_v40 = vand.u32 127, %v267_v9 }
  0x28   :  { %v170_v7 = vpack.c.bf16 %v1057_v5, %v1055_v4  ;;  %v266_v12 = vperm.slane %v264_v11, 0  ;;  %v273_v13 = vperm.slane %v264_v11, 1  ;;  %v627_v14 = vld [vmem:[%s1120_s7] ss:$0 sm:$0xff]  ;;  %vm400_vm3 = vcmask 1042432   ;;  %v604_v9 = vld [vmem:[#allocation14 + $0x8] sm:$0xff] }
  0x29   :  { %623 = vset.pattern.permute.xlu1 %v268_v10  ;;  %v628_v25 = vld [vmem:[%s1121_s8] ss:$0 sm:$0xff]  ;;  %v603_v10 = vld [vmem:[#allocation14] sm:$0xff]  ;;  %vm396_vm4 = vcmask 310272   ;;  %s939_s7 = smov 32   ;;  %vm501_vm9 = vcmask 254976  }
  0x2a   :  { %198 = vmatpush.bf16.msra.mxu0 %v597_v2  ;;  %236 = vmatpush.bf16.msra.mxu1 %v599_v3  ;;  %v380_v3 = vld [vmem:[#allocation14 + $0x10] sm:$0x7]  ;;  %s941_s0 = smov [#allocation17]   ;;  %s526_s24 = sshll.u32 %s1126_s13, 4  ;;  %s527_s24 = int_to_ptr.hbm [resolvable:$true] %s526_s24 }
  0x2b   :  { %v390_v6 = vunpack.c.l.b16 %v380_v3  ;;  %s524_s21 = sshll.u32 %s941_s0, 4  ;;  %s942_s25 = smov [#allocation19]   ;;  %s525_s21 = int_to_ptr.vmem [resolvable:$true] %s524_s21 }
  0x2c   :  { %s535_s1 = sshll.u32 %s942_s25, 4  ;;  %s537_s2 = sshll.u32 %s1127_s14, 4  ;;  %s536_s1 = int_to_ptr.vmem [resolvable:$true] %s535_s1  ;;  %s538_s2 = int_to_ptr.hbm [resolvable:$true] %s537_s2 }
  0x2d   :  { %568 = vmatmul.msk.bf16.vlgmr.msra.gmra.mxu0 %vm187_vm0, %v170_v7  ;;  %577 = vmatmul.msk.bf16.vlgmr.msra.gmra.mxu1 %vm187_vm0, %v205_v8  ;;  %v393_v7 = vpack.c.b16 %v390_v6, %v390_v6  ;;  %s515_s5 = sshll.u32 %s1125_s12, 4  ;;  %s516_s5 = int_to_ptr.hbm [resolvable:$true] %s515_s5 }
  0x2f   :  { %v402_v8 = vsel %vm400_vm3, %v393_v7, 0 }
  0x30   :  { %409 = vmatpush.bf16.msra.mxu2 %v402_v8 }
  0x31   :  { %271 = vperm.xlu1 %623, %v266_v12   ;;  %v374_v12 = vld [vmem:[#allocation8] sm:$0x3] }
  0x34   :  { %410 = vmatpush.bf16.msra.mxu2 %v604_v9 }
  0x38   :  { %411 = vmatpush.bf16.msra.mxu2 %v603_v10 }
  0x39   :  { %278 = vperm.xlu1 %623, %v273_v13   ;;  %v375_v13 = vpack.c.bf16 %v374_v12, %v374_v12 }
  0x3b   :  { %586 = vmatmul.msk.bf16.vlgmr.msra.gmra.mxu2 %vm396_vm4, %v375_v13 }
  0x41   :  { %625 = vset.pattern.permute.xlu1 %v938_v32 }
  0xa3   :  { %v272_v33 = vpop.permute.xlu1 %271 }
  0xaa   :  { %v200_v15 = vpop.f32.mrf.mxu0  ;;  %v238_v16 = vpop.f32.mrf.mxu1 }
  0xab   :  { %v239_v17 = vadd.f32 %v627_v14, %v238_v16  ;;  %v279_v36 = vpop.permute.xlu1 %278  ;;  %v602_v14 = vld [vmem:[#allocation13 + $0x8] sm:$0xff]  ;;  %v601_v16 = vld [vmem:[#allocation13] sm:$0xff] }
  0xac   :  { %444 = vmatpush.bf16.msra.mxu3 %v602_v14 }
  0xad   :  { %v243_v18 = vrot.slane %v239_v17, 1  ;;  %v244_v19 = vperm.slane %v239_v17, 0 }
  0xaf   :  { %v248_v20 = vadd.f32 %v244_v19, %v200_v15  ;;  %v245_v21 = vperm.slane %v243_v18, 0  ;;  %v167_v19 = vld [vmem:[#allocation5] sm:$0x3] }
  0xb0   :  { %445 = vmatpush.bf16.msra.mxu3 %v601_v16 }
  0xb1   :  { %630 = vtanh.f32 %v248_v20 }
  0xb2   :  { %v202_v22 = vpop.f32.mrf.mxu0  ;;  %v240_v23 = vpop.f32.mrf.mxu1 }
  0xb3   :  { %v249_v24 = vadd.f32 %v245_v21, %v202_v22 }
  0xb5   :  { %632 = vtanh.f32 %v249_v24 }
  0xb7   :  { %v631_v26 = vpop.eup %630 }
  0xb8   :  { %v256_v27 = vmul.f32 %v631_v26, %v628_v25 }
  0xba   :  { %v258_v28 = vsel %vm187_vm0, %v256_v27, 0.0 }
  0xbb   :  { %v633_v29 = vpop.eup %632  ;;  %259 = vadd.xlane.f32.xlu0 %v258_v28 }
  0xbc   :  { %v257_v30 = vmul.f32 %v633_v29, %v628_v25 }
  0xbe   :  { %v261_v31 = vsel %vm187_vm0, %v257_v30, 0.0 }
  0xc3   :  { %262 = vadd.xlane.f32.xlu0 %v261_v31 }
 0x12e   :  { %v260_v34 = vpop.xlane.xlu0 %259 }
 0x12f   :  { %v282_v35 = vadd.f32 %v272_v33, %v260_v34 }
 0x131   :  { %287 = vperm.xlu2 %624, %v282_v35  }
 0x136   :  { %v263_v37 = vpop.xlane.xlu0 %262 }
 0x137   :  { %v283_v38 = vadd.f32 %v279_v36, %v263_v37 }
 0x139   :  { %290 = vperm.xlu2 %624, %v283_v38  }
 0x18b   :  { %v288_v39 = vpop.permute.xlu2 %287 }
 0x18c   :  { %v294_v42 = vperm.slane %v288_v39, %v1074_v40 }
 0x193   :  { %v291_v41 = vpop.permute.xlu2 %290 }
 0x194   :  { %v295_v43 = vperm.slane %v291_v41, %v1074_v40  ;;  %v413_v41 = vpop.f32.mrf.mxu2 }
 0x196   :  { %v297_v44 = vsel %vm296_vm1, %v295_v43, %v294_v42  ;;  %v629_v43 = vld [vmem:[%s1124_s11] ss:$0 sm:$0xff]  ;;  %s940_s11 = smov 96  }
 0x197   :  { %v300_v45 = vsel %vm299_vm2, %v297_v44, -inf }
 0x198   :  { %301 = vmax.xlane.f32.xlu0 %v300_v45 }
 0x19c   :  { %v415_v42 = vpop.f32.mrf.mxu2 }
 0x20b   :  { %v302_v46 = vpop.xlane.xlu0 %301 }
 0x20c   :  { %v304_v47 = vperm.slane %v302_v46, 0  ;;  %v305_v48 = vperm.slane %v302_v46, 1 }
 0x20e   :  { %v308_v49 = vsub.f32 %v282_v35, %v304_v47  ;;  %v309_v50 = vsub.f32 %v283_v38, %v305_v48 }
 0x210   :  { %v310_v51 = vmul.f32 1.442695, %v308_v49  ;;  %v312_v52 = vmul.f32 1.442695, %v309_v50 }
 0x212   :  { %634 = vpow2.f32 %v310_v51 }
 0x213   :  { %636 = vpow2.f32 %v312_v52 }
 0x218   :  { %v635_v53 = vpop.eup %634 }
 0x219   :  { %v637_v54 = vpop.eup %636  ;;  %317 = vperm.xlu1 %625, %v635_v53  }
 0x21a   :  { %320 = vperm.xlu2 %624, %v637_v54  }
 0x274   :  { %v321_v55 = vpop.permute.xlu2 %320 }
 0x275   :  { %v323_v57 = vperm.slane %v321_v55, %v1074_v40 }
 0x28b   :  { %v318_v56 = vpop.permute.xlu1 %317 }
 0x28c   :  { %v322_v58 = vperm.slane %v318_v56, %v1074_v40 }
 0x28e   :  { %v324_v59 = vsel %vm296_vm1, %v323_v57, %v322_v58 }
 0x28f   :  { %v326_v60 = vsel %vm299_vm2, %v324_v59, 0.0 }
 0x290   :  { %327 = vadd.xlane.f32.xlu0 %v326_v60 }
 0x303   :  { %v328_v61 = vpop.xlane.xlu0 %327 }
 0x304   :  { %638 = vrcp.f32 %v328_v61 }
 0x30a   :  { %v639_v62 = vpop.eup %638 }
 0x30b   :  { %v332_v63 = vperm.slane %v639_v62, 1  ;;  %v331_v0 = vperm.slane %v639_v62, 0 }
 0x30d   :  { %v336_v1 = vmul.f32 %v637_v54, %v332_v63  ;;  %v335_v2 = vmul.f32 %v635_v53, %v331_v0 }
 0x30f   :  { %343 = vperm.xlu2 %624, %v336_v1   ;;  %340 = vperm.xlu1 %625, %v335_v2  }
 0x317   :  { %477 = vrot.lane.b32.xlu1 %v167_v19, %s939_s7 }
 0x369   :  { %v344_v11 = vpop.permute.xlu2 %343 }
 0x36a   :  { %v353_v15 = vmul.f32 %v344_v11, %v1057_v5  ;;  %v346_v23 = vperm.slane %v344_v11, %v1074_v40 }
 0x36c   :  { %v361_v17 = vsel %vm187_vm0, %v353_v15, 0.0 }
 0x36d   :  { %v362_v18 = vrot.slane %v361_v17, 4 }
 0x36f   :  { %v363_v20 = vadd.f32 %v362_v18, %v361_v17 }
 0x371   :  { %v364_v21 = vrot.slane %v363_v20, 2 }
 0x373   :  { %v365_v25 = vadd.f32 %v364_v21, %v363_v20 }
 0x375   :  { %v366_v29 = vrot.slane %v365_v25, 1 }
 0x377   :  { %v367_v32 = vadd.f32 %v366_v29, %v365_v25 }
 0x379   :  { %v369_v36 = vpack.c.bf16 %v367_v32, %v367_v32 }
 0x37b   :  { %v420_v39 = vunpack.c.l.b16 %v369_v36 }
 0x381   :  { %v341_v22 = vpop.permute.xlu1 %340 }
 0x382   :  { %v345_v24 = vperm.slane %v341_v22, %v1074_v40  ;;  %v352_v5 = vmul.f32 %v341_v22, %v1055_v4 }
 0x384   :  { %v347_v26 = vsel %vm296_vm1, %v346_v23, %v345_v24  ;;  %v354_v27 = vsel %vm187_vm0, %v352_v5, 0.0 }
 0x385   :  { %v355_v28 = vrot.slane %v354_v27, 4  ;;  %349 = vst.msk [vmem:[#allocation19] sm:$0x3] %vm299_vm2, %v347_v26 }
 0x387   :  { %v356_v30 = vadd.f32 %v355_v28, %v354_v27 }
 0x389   :  { %v357_v31 = vrot.slane %v356_v30, 2  ;;  %v478_v0 = vpop.permute.xlu1 %477 }
 0x38b   :  { %v358_v33 = vadd.f32 %v357_v31, %v356_v30 }
 0x38d   :  { %v359_v34 = vrot.slane %v358_v33, 1 }
 0x38f   :  { %v360_v35 = vadd.f32 %v359_v34, %v358_v33 }
 0x391   :  { %v368_v37 = vpack.c.bf16 %v360_v35, %v360_v35 }
 0x393   :  { %v419_v38 = vunpack.c.l.b16 %v368_v37 }
 0x395   :  { %v421_v4 = vsel %vm296_vm1, %v420_v39, %v419_v38 }
 0x396   :  { %v422_v40 = vpack.c.b16 %v421_v4, %v421_v4 }
 0x398   :  { %595 = vmatmul.msk.bf16.vlgmr.msra.gmra.mxu3 %vm187_vm0, %v422_v40 }
 0x41b   :  { %v447_v44 = vpop.f32.mrf.mxu3 }
 0x41c   :  { %v448_v45 = vadd.f32 %v447_v44, %v413_v41 }
 0x41e   :  { %v455_v46 = vadd.f32 %v629_v43, %v448_v45 }
 0x420   :  { %640 = vtanh.f32 %v455_v46  ;;  %v596_v49 = vmul.f32 -1.442695, %v455_v46 }
 0x422   :  { %642 = vpow2.f32 %v596_v49 }
 0x423   :  { %v449_v47 = vpop.f32.mrf.mxu3 }
 0x426   :  { %v641_v48 = vpop.eup %640 }
 0x427   :  { %482 = vrot.lane.b32.xlu0 %v641_v48, %s929_s30 }
 0x428   :  { %v643_v50 = vpop.eup %642 }
 0x429   :  { %v459_v51 = vadd.f32 1.0, %v643_v50 }
 0x42b   :  { %644 = vrcp.f32 %v459_v51  ;;  %v471_v57 = vand.u32 2147483648, %v459_v51  ;;  %vm465_vm6 = vweird.f32 %v459_v51  ;;  %v469_v58 = vand.u32 2147483647, %v459_v51 }
 0x42d   :  { %v472_v60 = vor.u32 1.1754944e-38, %v471_v57  ;;  %vm470_vm8 = vcmp.eq.f32.partialorder %v469_v58, 8.507059e+37 }
 0x431   :  { %v645_v52 = vpop.eup %644 }
 0x432   :  { %v461_v53 = vmul.f32 %v645_v52, %v459_v51  ;;  %vm466_vm5 = vweird.f32 %v645_v52 }
 0x433   :  { %vm467_vm7 = vmor %vm465_vm6, %vm466_vm5 }
 0x434   :  { %v462_v54 = vsub.f32 1.0, %v461_v53 }
 0x436   :  { %v463_v55 = vmul.f32 %v645_v52, %v462_v54 }
 0x438   :  { %v464_v56 = vadd.f32 %v645_v52, %v463_v55 }
 0x43a   :  { %v468_v59 = vsel %vm467_vm7, %v645_v52, %v464_v56 }
 0x43b   :  { %v473_v61 = vsel %vm470_vm8, %v472_v60, %v468_v59 }
 0x43c   :  { %v480_v1 = vmul.f32 %v478_v0, %v473_v61 }
 0x499   :  { %v483_v62 = vpop.permute.xlu0 %482 }
 0x49a   :  { %v485_v63 = vmul.f32 %v483_v62, %v473_v61 }
 0x49c   :  { %487 = vrot.lane.b32.xlu2 %v485_v63, %s939_s7 }
 0x4f6   :  { %v488_v2 = vpop.permute.xlu2 %487 }
 0x4f7   :  { %v490_v3 = vadd.f32 %v488_v2, %v480_v1 }
 0x4f9   :  { %646 = vtanh.f32 %v490_v3  ;;  %504 = vrot.lane.b32.xlu2 %v490_v3, %s940_s11 }
 0x4ff   :  { %v647_v6 = vpop.eup %646 }
 0x500   :  { %493 = vrot.lane.b32.xlu1 %v647_v6, %s929_s30  ;;  %s943_s30 = smov [#allocation16]  }
 0x501   :  { %s513_s28 = sshll.u32 %s943_s30, 4  ;;  %s514_s28 = int_to_ptr.vmem [resolvable:$true] %s513_s28 }
 0x553   :  { %v505_v7 = vpop.permute.xlu2 %504 }
 0x554   :  { %507 = vst.msk [vmem:[#allocation17] sm:$0x3] %vm501_vm9, %v505_v7 }
 0x555   :  { %529 = dma.vmem_to_hbm [thread:$0]  %s525_s21, 32, %s527_s24, [#allocation18]  }
 0x556   :  { %540 = dma.vmem_to_hbm [thread:$0]  %s536_s1, 32, %s538_s2, [#allocation18]  }
 0x572   :  { %v494_v8 = vpop.permute.xlu1 %493 }
 0x573   :  { %v496_v9 = vmul.f32 %v494_v8, %v473_v61 }
 0x575   :  { %498 = vrot.lane.b32.xlu1 %v496_v9, %s939_s7 }
 0x5e7   :  { %v499_v10 = vpop.permute.xlu1 %498 }
 0x5e8   :  { %502 = vst.msk [vmem:[#allocation16] sm:$0x3] %vm501_vm9, %v499_v10 }
 0x5e9   :  { %518 = dma.vmem_to_hbm [thread:$0]  %s514_s28, 32, %s516_s5, [#allocation4]  }
 0x5ea   :  { %922 = dma.done.wait [#allocation4], 32  }
 0x5eb   :  { %923 = vsyncadd [#allocation4], 4294967264 }
 0x5ec   :  { %924 = dma.done.wait [#allocation18], 64  }
 0x5ed   :  { %925 = vsyncadd [#allocation18], 4294967232 }
 0x5ee   :  { %553 = vsyncpa [#allocation3], 1 }
 0x5ef   :  { %554 = vsyncpa [#allocation6], 1 }
 0x5f0   :  { %555 = vsyncpa [#allocation9], 1 }
 0x5f1   :  { %556 = vsyncpa [#allocation12], 1 }
 0x5f2   :  { %557 = vsyncpa [#allocation15], 1 }
 0x5f3   :  { %558 = vsyncpa [#allocation4], 1 }
 0x5f4   :  { %559 = vsyncpa [#allocation18], 1 }

</bundles_post_ra>
